<compile_context>
chip_gen: v5e
topology: v5e:2x2
jax: 0.10.0
libtpu: 0.0.40
codegen_flags: <defaults>
</compile_context>

<pallas_src>
import functools

import jax
import jax.numpy as jnp
from jax.experimental import pallas as pl
from jax.experimental.pallas import tpu as pltpu


_LANES = 128                     # lane width of every block (last dim)
_SUBLANE_F32 = 8                 # f32 native sublane tile
_SUBLANE_I8 = 32                 # int8 packs 32 sublanes per vreg
_TARGET_BLOCK_ELEMS = 256 * 1024  # ~1 MiB of f32 x per block
_MAX_BLOCK_ROWS = _TARGET_BLOCK_ELEMS // _LANES   # 2048 rows


def _if_kernel(x_ref, v_in_ref, acc_in_ref, spk_ref, v_ref, acc_ref,
               *, dt, v_th, v_r):
    """One grid point = one (row_block, time_step).

    x_ref      : VMEM  [R,L] input current at this time step (streamed, any float dtype)
    v_in_ref   : VMEM f32[R,L] initial membrane potential (read at step 0)
    acc_in_ref : VMEM i32[R,L] initial spike counts       (read at step 0)
    spk_ref    : VMEM i8 [R,L] spikes (0/1) for this step (streamed)
    v_ref      : VMEM f32[R,L] membrane potential  (resident across all steps)
    acc_ref    : VMEM i32[R,L] spike counts        (resident across all steps)
    """
    step = pl.program_id(1)

    @pl.when(step == 0)
    def _():
        # Seed the resident state blocks from the incoming state.
        v_ref[...] = v_in_ref[...]
        acc_ref[...] = acc_in_ref[...]

    v = v_ref[...] + x_ref[...].astype(jnp.float32) * dt      # v += x * dt
    spk = v > v_th                                             # spikes = v > v_th
    # v[spikes] -= (v_th - v_r), expressed without a select.
    v_ref[...] = v - spk.astype(jnp.float32) * (v_th - v_r)
    acc_ref[...] = acc_ref[...] + spk.astype(jnp.int32)        # spikes_accum += spikes
    spk_ref[...] = spk.astype(jnp.int8)


def _round_up(x, m):
    return (x + m - 1) // m * m


def _choose_layout(n):
    """Pick a (rows, block_rows) layout for n elements flattened to (rows, 128).

    Preference order:
      1. tiny tensors: one block (no padding copy, shape == full array).
      2. copy-free layouts: block_rows is a divisor of rows, a multiple of 32
         (falling back to 8), <= _MAX_BLOCK_ROWS, and gives >= 2 row blocks
         (so the parallel axis shards across both TensorCores on v7x).
      3. otherwise: pad rows up to a bounded, 32-aligned block size.
    """
    rows0 = -(-n // _LANES)

    # Tiny tensors: a single resident block; megacore sharding is pointless.
    if rows0 <= 2 * _SUBLANE_I8:
        rows = _round_up(rows0, _SUBLANE_F32)
        return rows, rows

    def best_divisor(rows, step):
        hi = min(_MAX_BLOCK_ROWS, rows // 2)     # force >= 2 row blocks
        d = (hi // step) * step
        while d >= step:
            if rows % d == 0:
                return d
            d -= step
        return None

    if n % _LANES == 0:
        br = best_divisor(rows0, _SUBLANE_I8)
        if br is None:
            br = best_divisor(rows0, _SUBLANE_F32)
        if br is not None:
            return rows0, br

    # Padding fallback: bounded block, 32-aligned, minimal padding.
    nrb = max(2, -(-rows0 // _MAX_BLOCK_ROWS))
    br = _round_up(-(-rows0 // nrb), _SUBLANE_I8)
    rows = br * nrb
    return rows, br


@functools.partial(jax.jit,
                   static_argnames=("dt", "v_th", "v_r"),
                   donate_argnums=(1, 2))
def if_run(xs, v, spikes_accum, t, *, dt=0.001, v_th=1.0, v_r=0.0):
    """Run T fused IF steps (T = xs.shape[0]) in a single pallas_call.

    xs           : float (T, *state_shape) input currents (f32 or bf16)
    v            : f32 state_shape membrane potential state (donated)
    spikes_accum : i32 state_shape accumulated spikes state (donated)
    t            : i32 scalar step counter

    Returns (spikes_i8_(T,*state_shape), v_new, spikes_accum_new, t_new).
    Spikes are returned as int8 0/1 (identical truth values to the module's
    bool `spikes`) to avoid a separate full-HBM-pass bool cast.
    """
    T = xs.shape[0]
    state_shape = v.shape
    n = int(v.size)
    rows, br = _choose_layout(n)
    nrb = rows // br
    n_pad = rows * _LANES

    if not jnp.issubdtype(xs.dtype, jnp.floating):
        xs = xs.astype(jnp.float32)
    if v.dtype != jnp.float32:
        v = v.astype(jnp.float32)
    if spikes_accum.dtype != jnp.int32:
        spikes_accum = spikes_accum.astype(jnp.int32)

    x2 = xs.reshape(T, n)
    v1 = v.reshape(n)
    a1 = spikes_accum.reshape(n)
    if n_pad != n:
        pad = n_pad - n
        x2 = jnp.pad(x2, ((0, 0), (0, pad)))
        v1 = jnp.pad(v1, (0, pad))
        a1 = jnp.pad(a1, (0, pad))
    x3 = x2.reshape(T, rows, _LANES)
    v2 = v1.reshape(rows, _LANES)
    a2 = a1.reshape(rows, _LANES)

    kernel = functools.partial(
        _if_kernel, dt=float(dt), v_th=float(v_th), v_r=float(v_r))

    spk_i8, v_new, acc_new = pl.pallas_call(
        kernel,
        grid=(nrb, T),
        in_specs=[
            # x_t: streamed per (row block, time step).
            pl.BlockSpec((None, br, _LANES), lambda r, s: (s, r, 0)),
            # Initial state: fetched once per row block (constant in s).
            pl.BlockSpec((br, _LANES), lambda r, s: (r, 0)),
            pl.BlockSpec((br, _LANES), lambda r, s: (r, 0)),
        ],
        out_specs=(
            # Spikes for each step: streamed out per time step.
            pl.BlockSpec((None, br, _LANES), lambda r, s: (s, r, 0)),
            # State: resident in VMEM across the time axis, written back once.
            pl.BlockSpec((br, _LANES), lambda r, s: (r, 0)),
            pl.BlockSpec((br, _LANES), lambda r, s: (r, 0)),
        ),
        out_shape=(
            jax.ShapeDtypeStruct((T, rows, _LANES), jnp.int8),
            jax.ShapeDtypeStruct((rows, _LANES), jnp.float32),
            jax.ShapeDtypeStruct((rows, _LANES), jnp.int32),
        ),
        # Update v and spikes_accum in place (v -> v_out, acc -> acc_out).
        input_output_aliases={1: 1, 2: 2},
        compiler_params=pltpu.CompilerParams(
            dimension_semantics=("parallel", "arbitrary"),
            vmem_limit_bytes=48 * 1024 * 1024),
    )(x3, v2, a2)

    if n_pad != n:
        spk_i8 = spk_i8.reshape(T, n_pad)[:, :n]
        v_new = v_new.reshape(n_pad)[:n]
        acc_new = acc_new.reshape(n_pad)[:n]

    return (spk_i8.reshape((T,) + state_shape),
            v_new.reshape(state_shape),
            acc_new.reshape(state_shape),
            t + T)


def if_step(x, v, spikes_accum, t, *, dt=0.001, v_th=1.0, v_r=0.0):
    """One forward() call of the IF module (single time step)."""
    spikes, v_new, acc_new, t_new = if_run(
        x[None], v, spikes_accum, t, dt=dt, v_th=v_th, v_r=v_r)
    return spikes[0], v_new, acc_new, t_new


def get_activation(spikes_accum, t, *, dt=0.001, v_th=1.0, v_r=0.0):
    """Equivalent of SpikingNeuron.get_activation()."""
    return spikes_accum.astype(jnp.float32) * (v_th - v_r) / (
        t.astype(jnp.float32) * dt)


if __name__ == "__main__":
    key = jax.random.PRNGKey(0)
    B, C, H, W = 2, 4, 16, 16
    T = 8
    dt, v_th, v_r = 0.001, 1.0, 0.0

    # Input currents; scaled so a good fraction of neurons cross threshold.
    xs = jax.random.uniform(key, (T, B, C, H, W), dtype=jnp.float32) * 300.0

    # setup(x): v = zeros_like(x), spikes_accum = zeros int32, t = 0.
    v0 = jnp.zeros((B, C, H, W), jnp.float32)
    acc0 = jnp.zeros((B, C, H, W), jnp.int32)
    t0 = jnp.array(0, jnp.int32)

    spikes, v, acc, t = if_run(xs, v0, acc0, t0, dt=dt, v_th=v_th, v_r=v_r)
    jax.block_until_ready((spikes, v, acc, t))

    # Pure-JAX reference of T steps (fresh state buffers; v0/acc0 were donated).
    def ref_step(carry, x):
        vr, ar = carry
        vr = vr + x * dt
        spk = vr > v_th
        ar = ar + spk.astype(jnp.int32)
        vr = jnp.where(spk, vr - (v_th - v_r), vr)
        return (vr, ar), spk

    (v_ref, acc_ref), spk_ref = jax.lax.scan(
        ref_step,
        (jnp.zeros((B, C, H, W), jnp.float32),
         jnp.zeros((B, C, H, W), jnp.int32)),
        xs)

    assert spikes.shape == (T, B, C, H, W) and spikes.dtype == jnp.int8
    assert bool(jnp.all(spikes == spk_ref.astype(jnp.int8)))
    assert bool(jnp.all(acc == acc_ref))
    assert bool(jnp.allclose(v, v_ref, atol=1e-6))
    assert int(t) == T

    # Also exercise the single-step path (one PyTorch forward() call).
    spk1, v1, acc1, t1 = if_step(
        xs[0],
        jnp.zeros((B, C, H, W), jnp.float32),
        jnp.zeros((B, C, H, W), jnp.int32),
        jnp.array(0, jnp.int32),
        dt=dt, v_th=v_th, v_r=v_r)
    jax.block_until_ready((spk1, v1, acc1, t1))
    assert bool(jnp.all(spk1 == spk_ref[0].astype(jnp.int8)))
    assert int(t1) == 1

    print("KERNEL_OK")
</pallas_src>

<mosaic_0001>
module attributes {stable_mosaic.version = 11 : i64} {
  func.func @_if_kernel(%arg0: i32, %arg1: i32, %arg2: memref<1x16x128xf32, #tpu.memory_space<vmem>>, %arg3: memref<16x128xf32, #tpu.memory_space<vmem>>, %arg4: memref<16x128xi32, #tpu.memory_space<vmem>>, %arg5: memref<1x16x128xi8, #tpu.memory_space<vmem>>, %arg6: memref<16x128xf32, #tpu.memory_space<vmem>>, %arg7: memref<16x128xi32, #tpu.memory_space<vmem>>) attributes {dimension_semantics = [#tpu.dimension_semantics<parallel>, #tpu.dimension_semantics<arbitrary>], iteration_bounds = array<i64: 1, 8>, scalar_prefetch = 0 : i64, scratch_operands = 0 : i64, tpu.core_type = #tpu.core_type<tc>, window_params = [{transform_indices = @transform_0, window_bounds = array<i64: 1, 16, 128>}, {transform_indices = @transform_1, window_bounds = array<i64: 16, 128>}, {transform_indices = @transform_2, window_bounds = array<i64: 16, 128>}, {transform_indices = @transform_3, window_bounds = array<i64: 1, 16, 128>}, {transform_indices = @transform_4, window_bounds = array<i64: 16, 128>}, {transform_indices = @transform_5, window_bounds = array<i64: 16, 128>}]} {
    %c0_i32 = arith.constant 0 : i32
    %0 = arith.cmpi eq, %arg1, %c0_i32 : i32
    %1 = arith.extui %0 : i1 to i32
    %c0_i32_0 = arith.constant 0 : i32
    %2 = arith.cmpi ne, %1, %c0_i32_0 : i32
    scf.if %2 {
      %c0_16 = arith.constant 0 : index
      %c0_17 = arith.constant 0 : index
      %25 = vector.load %arg3[%c0_16, %c0_17] : memref<16x128xf32, #tpu.memory_space<vmem>>, vector<16x128xf32>
      %c0_18 = arith.constant 0 : index
      %c0_19 = arith.constant 0 : index
      %26 = vector.load %arg6[%c0_18, %c0_19] : memref<16x128xf32, #tpu.memory_space<vmem>>, vector<16x128xf32>
      tpu.vector_store %arg6[%c0_18, %c0_19], %25 {strides = array<i32>} : memref<16x128xf32, #tpu.memory_space<vmem>>, vector<16x128xf32>,
      %c0_20 = arith.constant 0 : index
      %c0_21 = arith.constant 0 : index
      %27 = vector.load %arg4[%c0_20, %c0_21] : memref<16x128xi32, #tpu.memory_space<vmem>>, vector<16x128xi32>
      %c0_22 = arith.constant 0 : index
      %c0_23 = arith.constant 0 : index
      %28 = vector.load %arg7[%c0_22, %c0_23] : memref<16x128xi32, #tpu.memory_space<vmem>>, vector<16x128xi32>
      tpu.vector_store %arg7[%c0_22, %c0_23], %27 {strides = array<i32>} : memref<16x128xi32, #tpu.memory_space<vmem>>, vector<16x128xi32>,
    } else {
    }
    %c0 = arith.constant 0 : index
    %c0_1 = arith.constant 0 : index
    %3 = vector.load %arg6[%c0, %c0_1] : memref<16x128xf32, #tpu.memory_space<vmem>>, vector<16x128xf32>
    %c0_2 = arith.constant 0 : index
    %c0_3 = arith.constant 0 : index
    %c0_4 = arith.constant 0 : index
    %4 = vector.load %arg2[%c0_2, %c0_3, %c0_4] : memref<1x16x128xf32, #tpu.memory_space<vmem>>, vector<1x16x128xf32>
    %5 = vector.shape_cast %4 : vector<1x16x128xf32> to vector<16x128xf32>
    %cst = arith.constant 1.000000e-03 : f32
    %6 = vector.broadcast %cst : f32 to vector<16x128xf32>
    %7 = arith.mulf %5, %6 : vector<16x128xf32>
    %8 = arith.addf %3, %7 : vector<16x128xf32>
    %cst_5 = arith.constant 1.000000e+00 : f32
    %9 = vector.broadcast %cst_5 : f32 to vector<16x128xf32>
    %10 = arith.cmpf ogt, %8, %9 : vector<16x128xf32>
    %11 = arith.extui %10 : vector<16x128xi1> to vector<16x128xi32>
    %12 = arith.sitofp %11 : vector<16x128xi32> to vector<16x128xf32>
    %cst_6 = arith.constant 1.000000e+00 : f32
    %13 = vector.broadcast %cst_6 : f32 to vector<16x128xf32>
    %14 = arith.mulf %12, %13 : vector<16x128xf32>
    %15 = arith.subf %8, %14 : vector<16x128xf32>
    %c0_7 = arith.constant 0 : index
    %c0_8 = arith.constant 0 : index
    %16 = vector.load %arg6[%c0_7, %c0_8] : memref<16x128xf32, #tpu.memory_space<vmem>>, vector<16x128xf32>
    tpu.vector_store %arg6[%c0_7, %c0_8], %15 {strides = array<i32>} : memref<16x128xf32, #tpu.memory_space<vmem>>, vector<16x128xf32>,
    %c0_9 = arith.constant 0 : index
    %c0_10 = arith.constant 0 : index
    %17 = vector.load %arg7[%c0_9, %c0_10] : memref<16x128xi32, #tpu.memory_space<vmem>>, vector<16x128xi32>
    %18 = arith.extui %10 : vector<16x128xi1> to vector<16x128xi32>
    %19 = arith.addi %17, %18 : vector<16x128xi32>
    %c0_11 = arith.constant 0 : index
    %c0_12 = arith.constant 0 : index
    %20 = vector.load %arg7[%c0_11, %c0_12] : memref<16x128xi32, #tpu.memory_space<vmem>>, vector<16x128xi32>
    tpu.vector_store %arg7[%c0_11, %c0_12], %19 {strides = array<i32>} : memref<16x128xi32, #tpu.memory_space<vmem>>, vector<16x128xi32>,
    %21 = arith.extui %10 : vector<16x128xi1> to vector<16x128xi8>
    %c0_13 = arith.constant 0 : index
    %c0_14 = arith.constant 0 : index
    %c0_15 = arith.constant 0 : index
    %22 = vector.load %arg5[%c0_13, %c0_14, %c0_15] : memref<1x16x128xi8, #tpu.memory_space<vmem>>, vector<1x16x128xi8>
    %23 = vector.shape_cast %22 : vector<1x16x128xi8> to vector<16x128xi8>
    %24 = vector.shape_cast %21 : vector<16x128xi8> to vector<1x16x128xi8>
    tpu.vector_store %arg5[%c0_13, %c0_14, %c0_15], %24 {strides = array<i32>} : memref<1x16x128xi8, #tpu.memory_space<vmem>>, vector<1x16x128xi8>,
    return
  }
  func.func @transform_0(%arg0: i32, %arg1: i32) -> (i32, i32, i32) {
    %c0_i32 = arith.constant 0 : i32
    %c0_i32_0 = arith.constant 0 : i32
    return %arg1, %arg0, %c0_i32 : i32, i32, i32
  }
  func.func @transform_1(%arg0: i32, %arg1: i32) -> (i32, i32) {
    %c0_i32 = arith.constant 0 : i32
    %c0_i32_0 = arith.constant 0 : i32
    return %arg0, %c0_i32 : i32, i32
  }
  func.func @transform_2(%arg0: i32, %arg1: i32) -> (i32, i32) {
    %c0_i32 = arith.constant 0 : i32
    %c0_i32_0 = arith.constant 0 : i32
    return %arg0, %c0_i32 : i32, i32
  }
  func.func @transform_3(%arg0: i32, %arg1: i32) -> (i32, i32, i32) {
    %c0_i32 = arith.constant 0 : i32
    %c0_i32_0 = arith.constant 0 : i32
    return %arg1, %arg0, %c0_i32 : i32, i32, i32
  }
  func.func @transform_4(%arg0: i32, %arg1: i32) -> (i32, i32) {
    %c0_i32 = arith.constant 0 : i32
    %c0_i32_0 = arith.constant 0 : i32
    return %arg0, %c0_i32 : i32, i32
  }
  func.func @transform_5(%arg0: i32, %arg1: i32) -> (i32, i32) {
    %c0_i32 = arith.constant 0 : i32
    %c0_i32_0 = arith.constant 0 : i32
    return %arg0, %c0_i32 : i32, i32
  }
}

</mosaic_0001>

<bundles_post_ra>
// kernel: if_run.1
= control target key start
LH: loop header
LB: loop body
LE: loop exit
PB: predicated region body
PF: predicated region fallthrough
CT: control target
= control target key end

     0   :  { %s670_s18 = smov 0   ;;  %s672_s19 = smov 0   ;;  %s755_s0 = inlined_call_operand.vmem [shape: f32[8,16,128], index: 0, kind: input, shape index: {}]   ;;  %s756_s1 = inlined_call_operand.vmem [shape: f32[16,128], index: 1, kind: input, shape index: {}, may-alias: {1,4}]   ;;  %s757_s2 = inlined_call_operand.vmem [shape: s32[16,128], index: 2, kind: input, shape index: {}, may-alias: {2,5}]   ;;  %s758_s3 = inlined_call_operand.vmem [shape: s8[8,16,128], index: 3, kind: output, shape index: {0}]   ;;  %s759_s4 = inlined_call_operand.vmem [shape: f32[16,128], index: 4, kind: output, shape index: {1}, may-alias: {1,4}]   ;;  %s760_s5 = inlined_call_operand.vmem [shape: s32[16,128], index: 5, kind: output, shape index: {2}, may-alias: {2,5}]  }
   0x1   :  { %s674_s20 = smov 0  }
   0x2 LB: > { %s25_s21 = sadd.s32 1, %s632_s19  ;;  %p572_p0 = scmp.ge.s32.totalorder %s636_s20, 1  ;;  %s636_s20 = sphi %s674_s20, %s16_s20   ;;  %s632_s19 = sphi %s672_s19, %s762_s19   ;;  %s628_s18 = sphi %s670_s18, %s761_s18  }
   0x3   : > { %p26_p1 = scmp.ge.s32.totalorder %s25_s21, 8  ;;  %p235_p2 = scmp.lt.s32.totalorder %s636_s20, 9 }
   0x5   : > { %s764_s21 = smov (%p26_p1, %s25_s21), 0  ;;  %p236_p3 = pnand %p572_p0, %p235_p2 }
   0x6   : > { %p292_p4 = scmp.lt.s32.totalorder (!%p236_p3), %s628_s18, 7  ;;  %p577_p5 = scmp.ne.s32.totalorder (!%p236_p3), %s628_s18, 0 }
   0x7   : > { %239 = sbr.rel (%p236_p3) target bundleno = 45 (0x2d), region = 32 }
   0xc   : > { %s293_s22 = scalar_select %p292_p4, %s628_s18, 7 }
   0xd   : > { %340 = sbr.rel (%p577_p5) target bundleno = 23 (0x17), region = 36 }
   0xe   : > { %s586_s23 = sshll.u32 %s293_s22, 4  ;;  %s587_s24 = sshll.u32 %s293_s22, 2 }
   0xf   : > { %s299_s27 = scalar_lea.vmem %s755_s0, %s586_s23  ;;  %s694_s30 = scalar_lea.vmem %s758_s3, %s587_s24 }
  0x12   : > { %v341_v0 = vld [vmem:[%s756_s1] sm:$0xff]  ;;  %v342_v1 = vld [vmem:[%s756_s1 + $0x8] sm:$0xff] }
  0x13   : > { %v345_v2 = vld [vmem:[%s757_s2] sm:$0xff]  ;;  %343 = vst [vmem:[%s759_s4] sm:$0xff] %v341_v0  ;;  %v346_v3 = vld [vmem:[%s757_s2 + $0x8] sm:$0xff] }
  0x14   : > { %344 = vst [vmem:[%s759_s4 + $0x8] sm:$0xff] %v342_v1 }
  0x15   : > { %347 = vst [vmem:[%s760_s5] sm:$0xff] %v345_v2 }
  0x16   : > { %348 = vst [vmem:[%s760_s5 + $0x8] sm:$0xff] %v346_v3 }
  0x17 PF: > { %v351_v5 = vld [vmem:[%s299_s27] sm:$0xff]  ;;  %v352_v8 = vld [vmem:[%s299_s27 + $0x8] sm:$0xff]  ;;  %v638_v14 = vmov 0.0   ;;  %v639_v16 = vmov 0  }
  0x18   : > { %v353_v6 = vmul.f32 0.001, %v351_v5  ;;  %v354_v9 = vmul.f32 0.001, %v352_v8 }
  0x1a   : > { %v349_v4 = vld [vmem:[%s759_s4] sm:$0xff] }
  0x1b   : > { %v350_v7 = vld [vmem:[%s759_s4 + $0x8] sm:$0xff]  ;;  %v355_v10 = vadd.f32 %v353_v6, %v349_v4 }
  0x1c   : > { %v356_v11 = vadd.f32 %v354_v9, %v350_v7  ;;  %v367_v12 = vld [vmem:[%s760_s5] sm:$0xff] }
  0x1d   : > { %vm357_vm0 = vcmp.gt.f32.partialorder %v355_v10, 1.0  ;;  %v368_v13 = vld [vmem:[%s760_s5 + $0x8] sm:$0xff] }
  0x1e   : > { %v578_v15 = vsel %vm357_vm0, 1.0, %v638_v14  ;;  %vm358_vm1 = vcmp.gt.f32.partialorder %v356_v11, 1.0  ;;  %v359_v17 = vsel %vm357_vm0, 1, %v639_v16 }
  0x1f   : > { %v363_v18 = vsub.f32 %v355_v10, %v578_v15  ;;  %v579_v19 = vsel %vm358_vm1, 1.0, %v638_v14  ;;  %v369_v20 = vadd.s32 %v367_v12, %v359_v17  ;;  %v360_v21 = vsel %vm358_vm1, 1, %v639_v16  ;;  %vm373_vm2 = vmpackc.low %vm358_vm1, %vm357_vm0 }
  0x20   : > { %v364_v22 = vsub.f32 %v356_v11, %v579_v19  ;;  %v370_v23 = vadd.s32 %v368_v13, %v360_v21  ;;  %v374_v24 = vsel %vm373_vm2, 16711935, %v639_v16 }
  0x21   : > { %365 = vst [vmem:[%s759_s4] sm:$0xff] %v363_v18  ;;  %v376_v25 = vpack.c.b8 %v374_v24, %v374_v24 }
  0x22   : > { %366 = vst [vmem:[%s759_s4 + $0x8] sm:$0xff] %v364_v22 }
  0x23   : > { %371 = vst [vmem:[%s760_s5] sm:$0xff] %v369_v20  ;;  %vm377_vm3 = vnez %v376_v25 }
  0x24   : > { %372 = vst [vmem:[%s760_s5 + $0x8] sm:$0xff] %v370_v23  ;;  %v378_v26 = vsel %vm377_vm3, 16843009, %v639_v16 }
  0x25   : > { %v379_v27 = vunpack.c.0.s8 %v378_v26  ;;  %v380_v28 = vunpack.c.1.s8 %v378_v26 }
  0x27   : > { %v381_v29 = vpack.c.b16 %v379_v27, %v379_v27  ;;  %v383_v30 = vpack.c.b16 %v380_v28, %v380_v28 }
  0x29   : > { %v382_v31 = vpack.c.b8 %v381_v29, %v381_v29  ;;  %v384_v32 = vpack.c.b8 %v383_v30, %v383_v30 }
  0x2b   : > { %385 = vst [vmem:[%s694_s30] sm:$0x3] %v382_v31 }
  0x2c   : > { %386 = vst [vmem:[%s694_s30 + $0x2] sm:$0x3] %v384_v32 }
  0x2d PF: > { %s16_s20 = sadd.s32 1, %s636_s20   ;;  %s761_s18 = smov %s632_s19 }
  0x2e   : > { %p13_p6 = scmp.ge.s32.totalorder %s16_s20, 10   ;;  %s762_s19 = smov %s764_s21 }
  0x30   :  { %15 = sbr.rel (!%p13_p6) target bundleno = 2 (0x2), region = 96 }

</bundles_post_ra>
